<compile_context>
chip_gen: v7x
topology: tpu7x:2x2x1
jax: 0.10.0
libtpu: 0.0.40
codegen_flags: <defaults>
</compile_context>

<pallas_src>
import functools

import jax
import jax.numpy as jnp
from jax.experimental import pallas as pl
from jax.experimental.pallas import tpu as pltpu

_NEG_BIG = -1e30  # pad value for b3's extra lanes (discrete softmax path)


def _round_up(x, m):
    return ((x + m - 1) // m) * m


def _actor_kernel(x_ref, w1_ref, b1_ref, w2_ref, b2_ref, w3_ref, b3_ref,
                  out_ref, *, continuous_action, action_scale, neg_slope,
                  compute_dtype):
    a_dim = out_ref.shape[-1]                 # true action_dim (narrow output)

    x = x_ref[...].astype(compute_dtype)      # (TB, S)

    # --- Linear 1 + LeakyReLU -------------------------------------------------
    h1 = jnp.dot(x, w1_ref[...], preferred_element_type=jnp.float32) + b1_ref[...]
    h1 = jnp.where(h1 > 0, h1, neg_slope * h1)

    # --- Linear 2 + LeakyReLU -------------------------------------------------
    h2 = jnp.dot(h1.astype(compute_dtype), w2_ref[...],
                 preferred_element_type=jnp.float32) + b2_ref[...]
    h2 = jnp.where(h2 > 0, h2, neg_slope * h2)

    # --- Linear 3 (logits, lane-padded to a multiple of 128 columns) ----------
    # Padded lanes: w3 columns are 0 and b3 is -1e30, so padded logits are
    # exactly -1e30 -> no explicit lane masking needed below.
    logits = jnp.dot(h2.astype(compute_dtype), w3_ref[...],
                     preferred_element_type=jnp.float32) + b3_ref[...]

    if continuous_action:
        result = jnp.tanh(logits) * action_scale
    else:
        # Numerically stable softmax; exp(-1e30 - m) underflows to exactly 0,
        # so the padded lanes never contribute to the max or the sum.
        m = jnp.max(logits, axis=-1, keepdims=True)
        e = jnp.exp(logits - m)
        s = jnp.sum(e, axis=-1, keepdims=True)
        # EUP approximate reciprocal + one Newton step (~ full f32 precision).
        inv = pl.reciprocal(s, approx=True)
        inv = inv * (2.0 - s * inv)
        result = e * inv

    # Narrow, per-row-independent store; padded lanes are simply dropped.
    out_ref[...] = result[:, :a_dim].astype(out_ref.dtype)


def prepare_actor_params(params):
    """One-time lane padding of the final layer (hoisted out of the call path).

    Returns (padded_params, action_dim). w3 gets zero-padded columns; b3's
    padded lanes are filled with -1e30 so the in-kernel softmax needs no mask.
    """
    w1, b1, w2, b2, w3, b3 = params
    action_dim = w3.shape[1]
    a_pad = _round_up(action_dim, 128)
    if a_pad != action_dim:
        w3 = jnp.pad(w3, ((0, 0), (0, a_pad - action_dim)))
        b3 = jnp.pad(b3, ((0, 0), (0, a_pad - action_dim)),
                     constant_values=_NEG_BIG)
    return (w1, b1, w2, b2, w3, b3), action_dim


def actor_forward(x, params, *, action_dim=None, continuous_action=False,
                  continuous_action_scale=2.0, negative_slope=0.01,
                  batch_tile=1024, min_grid_steps=2, use_bf16=False):
    """Actor MLP forward pass inside a batch-tiled Pallas TPU kernel.

    `params` should come from `prepare_actor_params` (with `action_dim` given);
    raw PyTorch-shaped params are also accepted and padded on the fly.
    """
    if action_dim is None:
        params, action_dim = prepare_actor_params(params)
    w1, b1, w2, b2, w3, b3 = params

    x = x.astype(jnp.float32)
    B, S = x.shape
    H = w1.shape[1]
    A_pad = w3.shape[1]
    A = action_dim

    compute_dtype = jnp.bfloat16 if use_bf16 else jnp.float32
    if use_bf16:
        # bf16 MXU operands; accumulation / bias / activations stay f32.
        x = x.astype(jnp.bfloat16)
        w1 = w1.astype(jnp.bfloat16)
        w2 = w2.astype(jnp.bfloat16)
        w3 = w3.astype(jnp.bfloat16)

    # Batch tile: large enough to amortize the ~0.35 us per-step overhead and
    # fill the MXU M dimension, but capped so the ("parallel",) batch axis has
    # at least `min_grid_steps` steps (lets both v7x TensorCores participate).
    # No batch padding: the ragged last tile is handled by masked OOB stores.
    TB = max(8, min(batch_tile, _round_up(pl.cdiv(B, min_grid_steps), 8)))
    grid = (pl.cdiv(B, TB),)

    kernel = functools.partial(
        _actor_kernel,
        continuous_action=continuous_action,
        action_scale=continuous_action_scale,
        neg_slope=negative_slope,
        compute_dtype=compute_dtype,
    )

    # x / out move with the batch-grid index; weights & biases stay resident.
    batched = lambda shape: pl.BlockSpec(shape, lambda i: (i, 0))
    resident = lambda shape: pl.BlockSpec(shape, lambda i: (0, 0))

    out = pl.pallas_call(
        kernel,
        out_shape=jax.ShapeDtypeStruct((B, A), jnp.float32),
        grid=grid,
        in_specs=[
            batched((TB, S)),       # x
            resident((S, H)),       # w1
            resident((1, H)),       # b1
            resident((H, H)),       # w2
            resident((1, H)),       # b2
            resident((H, A_pad)),   # w3 (lane-padded, zeros)
            resident((1, A_pad)),   # b3 (lane-padded, -1e30)
        ],
        out_specs=batched((TB, A)),
        compiler_params=pltpu.CompilerParams(
            dimension_semantics=("parallel",)),
    )(x, w1, b1, w2, b2, w3, b3)

    return out


def init_actor_params(key, state_dim, hidden, action_dim):
    """Deterministic init mimicking nn.Linear's U(-1/sqrt(fan_in), 1/sqrt(fan_in))."""
    ks = jax.random.split(key, 6)

    def linear(kw, kb, fan_in, fan_out):
        bound = 1.0 / jnp.sqrt(jnp.float32(fan_in))
        w = jax.random.uniform(kw, (fan_in, fan_out), jnp.float32, -bound, bound)
        b = jax.random.uniform(kb, (1, fan_out), jnp.float32, -bound, bound)
        return w, b

    w1, b1 = linear(ks[0], ks[1], state_dim, hidden)
    w2, b2 = linear(ks[2], ks[3], hidden, hidden)
    w3, b3 = linear(ks[4], ks[5], hidden, action_dim)
    return (w1, b1, w2, b2, w3, b3)


def _reference_forward(x, params, continuous_action, scale=2.0, slope=0.01):
    w1, b1, w2, b2, w3, b3 = params
    h = x @ w1 + b1
    h = jnp.where(h > 0, h, slope * h)
    h = h @ w2 + b2
    h = jnp.where(h > 0, h, slope * h)
    logits = h @ w3 + b3
    if continuous_action:
        return jnp.tanh(logits) * scale
    return jax.nn.softmax(logits, axis=-1)


if __name__ == "__main__":
    key = jax.random.PRNGKey(0)
    kx, kp = jax.random.split(key)

    batch = 8
    state_dim = 16
    hidden = 128
    action_dim = 6

    x = jax.random.normal(kx, (batch, state_dim), jnp.float32)
    raw_params = init_actor_params(kp, state_dim, hidden, action_dim)
    params, a_dim = prepare_actor_params(raw_params)   # one-time lane pad

    # Discrete-action branch (default in the PyTorch module): softmax probs.
    probs = actor_forward(x, params, action_dim=a_dim, continuous_action=False)
    probs = jax.block_until_ready(probs)

    # Continuous-action branch: tanh(logits) * 2.0.
    means = actor_forward(x, params, action_dim=a_dim, continuous_action=True)
    means = jax.block_until_ready(means)

    # Correctness checks against a pure-JAX reference (unpadded params).
    ref_probs = _reference_forward(x, raw_params, continuous_action=False)
    ref_means = _reference_forward(x, raw_params, continuous_action=True)
    assert probs.shape == (batch, action_dim)
    assert means.shape == (batch, action_dim)
    assert jnp.allclose(probs, ref_probs, atol=1e-5, rtol=1e-5)
    assert jnp.allclose(means, ref_means, atol=1e-5, rtol=1e-5)
    assert jnp.allclose(jnp.sum(probs, axis=-1), 1.0, atol=1e-5)

    # Larger ragged batch spanning multiple grid steps (no wrapper padding;
    # both v7x TensorCores get a share of the "parallel" batch axis).
    x_big = jax.random.normal(kx, (600, state_dim), jnp.float32)
    probs_big = jax.block_until_ready(
        actor_forward(x_big, params, action_dim=a_dim, continuous_action=False))
    ref_big = _reference_forward(x_big, raw_params, continuous_action=False)
    assert probs_big.shape == (600, action_dim)
    assert jnp.allclose(probs_big, ref_big, atol=1e-5, rtol=1e-5)

    # Optional bf16-MXU path (looser tolerance; f32 accumulation inside).
    probs_bf16 = jax.block_until_ready(
        actor_forward(x_big, params, action_dim=a_dim, use_bf16=True))
    assert probs_bf16.shape == (600, action_dim)
    assert jnp.allclose(probs_bf16, ref_big, atol=5e-2)

    print("KERNEL_OK")
</pallas_src>

<mosaic_0001>
module attributes {stable_mosaic.version = 11 : i64} {
  func.func @_actor_kernel(%arg0: i32, %arg1: memref<8x16xf32, #tpu.memory_space<vmem>>, %arg2: memref<16x128xf32, #tpu.memory_space<vmem>>, %arg3: memref<1x128xf32, #tpu.memory_space<vmem>>, %arg4: memref<128x128xf32, #tpu.memory_space<vmem>>, %arg5: memref<1x128xf32, #tpu.memory_space<vmem>>, %arg6: memref<128x128xf32, #tpu.memory_space<vmem>>, %arg7: memref<1x128xf32, #tpu.memory_space<vmem>>, %arg8: memref<8x6xf32, #tpu.memory_space<vmem>>) attributes {dimension_semantics = [#tpu.dimension_semantics<parallel>], iteration_bounds = array<i64: 1>, scalar_prefetch = 0 : i64, scratch_operands = 0 : i64, tpu.core_type = #tpu.core_type<tc>, window_params = [{transform_indices = @transform_0, window_bounds = array<i64: 8, 16>}, {pipeline_mode = #tpu.pipeline_mode<synchronous>, transform_indices = @transform_1, window_bounds = array<i64: 16, 128>}, {pipeline_mode = #tpu.pipeline_mode<synchronous>, transform_indices = @transform_2, window_bounds = array<i64: 1, 128>}, {pipeline_mode = #tpu.pipeline_mode<synchronous>, transform_indices = @transform_3, window_bounds = array<i64: 128, 128>}, {pipeline_mode = #tpu.pipeline_mode<synchronous>, transform_indices = @transform_4, window_bounds = array<i64: 1, 128>}, {pipeline_mode = #tpu.pipeline_mode<synchronous>, transform_indices = @transform_5, window_bounds = array<i64: 128, 128>}, {pipeline_mode = #tpu.pipeline_mode<synchronous>, transform_indices = @transform_6, window_bounds = array<i64: 1, 128>}, {transform_indices = @transform_7, window_bounds = array<i64: 8, 6>}]} {
    %c0 = arith.constant 0 : index
    %c0_0 = arith.constant 0 : index
    %0 = vector.load %arg1[%c0, %c0_0] : memref<8x16xf32, #tpu.memory_space<vmem>>, vector<8x16xf32>
    %c0_1 = arith.constant 0 : index
    %c0_2 = arith.constant 0 : index
    %1 = vector.load %arg2[%c0_1, %c0_2] : memref<16x128xf32, #tpu.memory_space<vmem>>, vector<16x128xf32>
    %cst = arith.constant dense<0.000000e+00> : vector<8x128xf32>
    %2 = tpu.matmul %0, %1, %cst {dimension_numbers = #tpu.dot_dimension_numbers<[1], [0], [0], [1], [0, 0, 1, 1], [], []>} : vector<8x16xf32>, vector<16x128xf32>, vector<8x128xf32> -> vector<8x128xf32>
    %c0_3 = arith.constant 0 : index
    %c0_4 = arith.constant 0 : index
    %3 = vector.load %arg3[%c0_3, %c0_4] : memref<1x128xf32, #tpu.memory_space<vmem>>, vector<1x128xf32>
    %4 = vector.broadcast %3 : vector<1x128xf32> to vector<8x128xf32>
    %5 = arith.addf %2, %4 : vector<8x128xf32>
    %cst_5 = arith.constant 0.000000e+00 : f32
    %6 = vector.broadcast %cst_5 : f32 to vector<8x128xf32>
    %7 = arith.cmpf ogt, %5, %6 : vector<8x128xf32>
    %cst_6 = arith.constant 0.00999999977 : f32
    %8 = vector.broadcast %cst_6 : f32 to vector<8x128xf32>
    %9 = arith.mulf %8, %5 : vector<8x128xf32>
    %10 = arith.select %7, %5, %9 : vector<8x128xi1>, vector<8x128xf32>
    %c0_7 = arith.constant 0 : index
    %c0_8 = arith.constant 0 : index
    %11 = vector.load %arg4[%c0_7, %c0_8] : memref<128x128xf32, #tpu.memory_space<vmem>>, vector<128x128xf32>
    %cst_9 = arith.constant dense<0.000000e+00> : vector<8x128xf32>
    %12 = tpu.matmul %10, %11, %cst_9 {dimension_numbers = #tpu.dot_dimension_numbers<[1], [0], [0], [1], [0, 0, 1, 1], [], []>} : vector<8x128xf32>, vector<128x128xf32>, vector<8x128xf32> -> vector<8x128xf32>
    %c0_10 = arith.constant 0 : index
    %c0_11 = arith.constant 0 : index
    %13 = vector.load %arg5[%c0_10, %c0_11] : memref<1x128xf32, #tpu.memory_space<vmem>>, vector<1x128xf32>
    %14 = vector.broadcast %13 : vector<1x128xf32> to vector<8x128xf32>
    %15 = arith.addf %12, %14 : vector<8x128xf32>
    %cst_12 = arith.constant 0.000000e+00 : f32
    %16 = vector.broadcast %cst_12 : f32 to vector<8x128xf32>
    %17 = arith.cmpf ogt, %15, %16 : vector<8x128xf32>
    %cst_13 = arith.constant 0.00999999977 : f32
    %18 = vector.broadcast %cst_13 : f32 to vector<8x128xf32>
    %19 = arith.mulf %18, %15 : vector<8x128xf32>
    %20 = arith.select %17, %15, %19 : vector<8x128xi1>, vector<8x128xf32>
    %c0_14 = arith.constant 0 : index
    %c0_15 = arith.constant 0 : index
    %21 = vector.load %arg6[%c0_14, %c0_15] : memref<128x128xf32, #tpu.memory_space<vmem>>, vector<128x128xf32>
    %cst_16 = arith.constant dense<0.000000e+00> : vector<8x128xf32>
    %22 = tpu.matmul %20, %21, %cst_16 {dimension_numbers = #tpu.dot_dimension_numbers<[1], [0], [0], [1], [0, 0, 1, 1], [], []>} : vector<8x128xf32>, vector<128x128xf32>, vector<8x128xf32> -> vector<8x128xf32>
    %c0_17 = arith.constant 0 : index
    %c0_18 = arith.constant 0 : index
    %23 = vector.load %arg7[%c0_17, %c0_18] : memref<1x128xf32, #tpu.memory_space<vmem>>, vector<1x128xf32>
    %24 = vector.broadcast %23 : vector<1x128xf32> to vector<8x128xf32>
    %25 = arith.addf %22, %24 : vector<8x128xf32>
    %cst_19 = arith.constant dense<0xFF800000> : vector<8xf32>
    %26 = vector.multi_reduction <maximumf>, %25, %cst_19 [1] : vector<8x128xf32> to vector<8xf32>
    %27 = vector.shape_cast %26 : vector<8xf32> to vector<8x1xf32>
    %28 = vector.broadcast %27 : vector<8x1xf32> to vector<8x128xf32>
    %29 = arith.subf %25, %28 : vector<8x128xf32>
    %30 = math.exp %29 : vector<8x128xf32>
    %cst_20 = arith.constant dense<0.000000e+00> : vector<8xf32>
    %31 = vector.multi_reduction <add>, %30, %cst_20 [1] : vector<8x128xf32> to vector<8xf32>
    %32 = vector.shape_cast %31 : vector<8xf32> to vector<8x1xf32>
    %33 = tpu.reciprocal %32 {approx = true} : vector<8x1xf32> -> vector<8x1xf32>
    %34 = arith.mulf %32, %33 : vector<8x1xf32>
    %cst_21 = arith.constant 2.000000e+00 : f32
    %35 = vector.broadcast %cst_21 : f32 to vector<8x1xf32>
    %36 = arith.subf %35, %34 : vector<8x1xf32>
    %37 = arith.mulf %33, %36 : vector<8x1xf32>
    %38 = vector.broadcast %37 : vector<8x1xf32> to vector<8x128xf32>
    %39 = arith.mulf %30, %38 : vector<8x128xf32>
    %40 = vector.extract_strided_slice %39 {offsets = [0, 0], sizes = [8, 6], strides = [1, 1]} : vector<8x128xf32> to vector<8x6xf32>
    %c0_22 = arith.constant 0 : index
    %c0_23 = arith.constant 0 : index
    %41 = vector.load %arg8[%c0_22, %c0_23] : memref<8x6xf32, #tpu.memory_space<vmem>>, vector<8x6xf32>
    tpu.vector_store %arg8[%c0_22, %c0_23], %40 {strides = array<i32>} : memref<8x6xf32, #tpu.memory_space<vmem>>, vector<8x6xf32>,
    return
  }
  func.func @transform_0(%arg0: i32) -> (i32, i32) {
    %c0_i32 = arith.constant 0 : i32
    %c0_i32_0 = arith.constant 0 : i32
    return %arg0, %c0_i32 : i32, i32
  }
  func.func @transform_1(%arg0: i32) -> (i32, i32) {
    %c0_i32 = arith.constant 0 : i32
    %c0_i32_0 = arith.constant 0 : i32
    %c0_i32_1 = arith.constant 0 : i32
    return %c0_i32, %c0_i32_0 : i32, i32
  }
  func.func @transform_2(%arg0: i32) -> (i32, i32) {
    %c0_i32 = arith.constant 0 : i32
    %c0_i32_0 = arith.constant 0 : i32
    %c0_i32_1 = arith.constant 0 : i32
    return %c0_i32, %c0_i32_0 : i32, i32
  }
  func.func @transform_3(%arg0: i32) -> (i32, i32) {
    %c0_i32 = arith.constant 0 : i32
    %c0_i32_0 = arith.constant 0 : i32
    %c0_i32_1 = arith.constant 0 : i32
    return %c0_i32, %c0_i32_0 : i32, i32
  }
  func.func @transform_4(%arg0: i32) -> (i32, i32) {
    %c0_i32 = arith.constant 0 : i32
    %c0_i32_0 = arith.constant 0 : i32
    %c0_i32_1 = arith.constant 0 : i32
    return %c0_i32, %c0_i32_0 : i32, i32
  }
  func.func @transform_5(%arg0: i32) -> (i32, i32) {
    %c0_i32 = arith.constant 0 : i32
    %c0_i32_0 = arith.constant 0 : i32
    %c0_i32_1 = arith.constant 0 : i32
    return %c0_i32, %c0_i32_0 : i32, i32
  }
  func.func @transform_6(%arg0: i32) -> (i32, i32) {
    %c0_i32 = arith.constant 0 : i32
    %c0_i32_0 = arith.constant 0 : i32
    %c0_i32_1 = arith.constant 0 : i32
    return %c0_i32, %c0_i32_0 : i32, i32
  }
  func.func @transform_7(%arg0: i32) -> (i32, i32) {
    %c0_i32 = arith.constant 0 : i32
    %c0_i32_0 = arith.constant 0 : i32
    return %arg0, %c0_i32 : i32, i32
  }
}

</mosaic_0001>

<bundles_post_ra>
// kernel: tpu_custom_call.1
= control target key start
LH: loop header
LB: loop body
LE: loop exit
PB: predicated region body
PF: predicated region fallthrough
CT: control target
= control target key end

     0   :  { %12 = vsyncpa [#allocation3], 0  ;;  %s836_s0 = inlined_call_operand.hbm [shape: f32[8,16], index: 0, kind: input, shape index: {}]   ;;  %s837_s1 = inlined_call_operand.hbm [shape: f32[16,128], index: 1, kind: input, shape index: {}]   ;;  %s838_s2 = inlined_call_operand.vmem [shape: f32[1,128], index: 2, kind: input, shape index: {}]   ;;  %s839_s3 = inlined_call_operand.hbm [shape: f32[128,128], index: 3, kind: input, shape index: {}]   ;;  %s840_s4 = inlined_call_operand.vmem [shape: f32[1,128], index: 4, kind: input, shape index: {}]   ;;  %s841_s5 = inlined_call_operand.hbm [shape: f32[128,128], index: 5, kind: input, shape index: {}]   ;;  %s842_s6 = inlined_call_operand.vmem [shape: f32[1,128], index: 6, kind: input, shape index: {}]   ;;  %s843_s7 = inlined_call_operand.hbm [shape: f32[8,6], index: 7, kind: output, shape index: {}]  }
   0x1   :  { %13 = vsyncpa [#allocation6], 0 }
   0x2   :  { %14 = vsyncpa [#allocation9], 0 }
   0x3   :  { %15 = vsyncpa [#allocation4], 0  ;;  %s688_s24 = smov [#allocation5]   ;;  %s570_s28 = scalar_lea.hbm %s837_s1, 256 }
   0x4   :  { %s31_s25 = sshll.u32 %s688_s24, 4  ;;  %p571_p0 = scmp.ne.s32.totalorder %s837_s1, %s570_s28  ;;  %s32_s25 = int_to_ptr.vmem [resolvable:$true] %s31_s25 }
   0x5   :  { %p574_p1 = scmp.lt.u32.totalorder %s570_s28, %s837_s1 }
   0x7   :  { %p576_p2 = pnand %p574_p1, %p571_p0 }
   0x9   :  { %579 = shalt.err (!%p576_p2)
}
   0xa   :  { %s580_s10 = scalar_lea.vmem %s32_s25, 256  ;;  %p585_p4 = scmp.lt.s32.totalorder %s32_s25, %s32_s25 }
   0xb   :  { %p581_p3 = scmp.ne.s32.totalorder %s32_s25, %s580_s10  ;;  %p586_p5 = scmp.lt.s32.totalorder %s580_s10, %s580_s10 }
   0xd   :  { %p587_p6 = por %p586_p5, %p585_p4 }
   0xf   :  { %p588_p7 = pnand %p587_p6, %p581_p3 }
  0x11   :  { %591 = shalt.err (!%p588_p7)
}
  0x12   :  { %s689_s11 = smov 128   ;;  %s690_s12 = smov 8  }
  0x13   :  { %37 = dma.hbm_to_vmem [thread:$0]  %s837_s1, 256, %s32_s25, [#allocation6], %s689_s11, %s689_s11, %s690_s12  }
  0x14   :  { %s691_s15 = smov [#allocation2]   ;;  %s692_s17 = smov [#allocation7]  }
  0x15   :  { %s22_s16 = sshll.u32 %s691_s15, 4  ;;  %s45_s18 = sshll.u32 %s692_s17, 4  ;;  %s23_s16 = int_to_ptr.vmem [resolvable:$true] %s22_s16  ;;  %s46_s18 = int_to_ptr.vmem [resolvable:$true] %s45_s18 }
  0x16   :  { %s592_s21 = scalar_lea.hbm %s836_s0, 128 }
  0x17   :  { %p593_p8 = scmp.ne.s32.totalorder %s836_s0, %s592_s21  ;;  %p596_p9 = scmp.lt.u32.totalorder %s592_s21, %s836_s0 }
  0x19   :  { %p598_p10 = pnand %p596_p9, %p593_p8 }
  0x1b   :  { %601 = shalt.err (!%p598_p10)
}
  0x1c   :  { %s602_s1 = scalar_lea.vmem %s23_s16, 128  ;;  %p607_p12 = scmp.lt.s32.totalorder %s23_s16, %s23_s16 }
  0x1d   :  { %p603_p11 = scmp.ne.s32.totalorder %s23_s16, %s602_s1  ;;  %p608_p13 = scmp.lt.s32.totalorder %s602_s1, %s602_s1 }
  0x1f   :  { %p609_p0 = por %p608_p13, %p607_p12 }
  0x21   :  { %p610_p1 = pnand %p609_p0, %p603_p11 }
  0x23   :  { %613 = shalt.err (!%p610_p1)
}
  0x24   :  { %25 = dma.hbm_to_vmem [thread:$0]  %s836_s0, 128, %s23_s16, [#allocation3]  }
  0x25   :  { %s614_s30 = scalar_lea.hbm %s839_s3, 2048 }
  0x26   :  { %p615_p2 = scmp.ne.s32.totalorder %s839_s3, %s614_s30  ;;  %p618_p3 = scmp.lt.u32.totalorder %s614_s30, %s839_s3 }
  0x28   :  { %p620_p4 = pnand %p618_p3, %p615_p2 }
  0x2a   :  { %623 = shalt.err (!%p620_p4)
}
  0x2b   :  { %s624_s14 = scalar_lea.vmem %s46_s18, 2048  ;;  %p629_p6 = scmp.lt.s32.totalorder %s46_s18, %s46_s18 }
  0x2c   :  { %p625_p5 = scmp.ne.s32.totalorder %s46_s18, %s624_s14  ;;  %p630_p7 = scmp.lt.s32.totalorder %s624_s14, %s624_s14 }
  0x2e   :  { %p631_p8 = por %p630_p7, %p629_p6 }
  0x30   :  { %p632_p9 = pnand %p631_p8, %p625_p5 }
  0x32   :  { %635 = shalt.err (!%p632_p9)
}
  0x33   :  { %51 = dma.hbm_to_vmem [thread:$0]  %s839_s3, 2048, %s46_s18, [#allocation6], %s689_s11, %s689_s11, %s690_s12  }
  0x34   :  { %s693_s16 = smov [#allocation8]   ;;  %s636_s21 = scalar_lea.hbm %s841_s5, 2048 }
  0x35   :  { %s59_s17 = sshll.u32 %s693_s16, 4  ;;  %p637_p10 = scmp.ne.s32.totalorder %s841_s5, %s636_s21  ;;  %s60_s17 = int_to_ptr.vmem [resolvable:$true] %s59_s17 }
  0x36   :  { %p640_p11 = scmp.lt.u32.totalorder %s636_s21, %s841_s5 }
  0x38   :  { %p642_p12 = pnand %p640_p11, %p637_p10 }
  0x3a   :  { %645 = shalt.err (!%p642_p12)
}
  0x3b   :  { %s646_s1 = scalar_lea.vmem %s60_s17, 2048  ;;  %p651_p0 = scmp.lt.s32.totalorder %s60_s17, %s60_s17 }
  0x3c   :  { %p647_p13 = scmp.ne.s32.totalorder %s60_s17, %s646_s1  ;;  %p652_p1 = scmp.lt.s32.totalorder %s646_s1, %s646_s1 }
  0x3e   :  { %p653_p2 = por %p652_p1, %p651_p0 }
  0x40   :  { %p654_p3 = pnand %p653_p2, %p647_p13 }
  0x42   :  { %657 = shalt.err (!%p654_p3)
}
  0x43   :  { %65 = dma.hbm_to_vmem [thread:$0]  %s841_s5, 2048, %s60_s17, [#allocation9], %s689_s11, %s689_s11, %s690_s12  }
  0x44   :  { %680 = dma.done.wait [#allocation3], 128  }
  0x45   :  { %681 = vsyncadd [#allocation3], 4294967168 }
  0x46   :  { %682 = dma.done.wait [#allocation6], 2304  }
  0x47   :  { %683 = vsyncadd [#allocation6], 4294964992 }
  0x48   :  { %684 = dma.done.wait [#allocation9], 2048  }
  0x49   :  { %685 = vsyncadd [#allocation9], 4294965248  ;;  %v694_v0 = vmov 0.0|0.0   ;;  %vm695_vm0 = vmmov 0   ;;  %v696_v1 = vmov 0.0   ;;  %v81_v2 = vld [vmem:[#allocation5] sm:$0xff] }
  0x4a   :  { %505 = vmatprep.subr.bf16.mxu0 %v694_v0  ;;  %432 = vmatprep.mubr.msk.f32.mxu0 %vm695_vm0, %v696_v1  ;;  %v82_v3 = vld [vmem:[#allocation5 + $0x8] sm:$0xff]  ;;  %v167_v5 = vld [vmem:[#allocation7] sm:$0xff]  ;;  %v168_v6 = vld [vmem:[#allocation7 + $0x8] sm:$0xff]  ;;  %vm90_vm1 = vcmask 130048   ;;  %vm368_vm4 = vcmask 48128  }
  0x4b   :  { %508 = vmatprep.subr.bf16.mxu1 %v694_v0  ;;  %467 = vmatprep.mubr.msk.f32.mxu1 %vm695_vm0, %v696_v1  ;;  %v506_v4 = vpack.c.bf16 %v82_v3, %v81_v2  ;;  %v169_v7 = vld [vmem:[#allocation7 + $0x10] sm:$0xff]  ;;  %v509_v8 = vpack.c.bf16 %v168_v6, %v167_v5  ;;  %v170_v9 = vld [vmem:[#allocation7 + $0x18] sm:$0xff]  ;;  %v80_v10 = vld [vmem:[#allocation2] sm:$0xff] }
  0x4c   :  { %v512_v11 = vpack.c.bf16 %v170_v9, %v169_v7  ;;  %v171_v12 = vld [vmem:[#allocation7 + $0x20] sm:$0xff]  ;;  %v172_v13 = vld [vmem:[#allocation7 + $0x28] sm:$0xff]  ;;  %v173_v15 = vld [vmem:[#allocation7 + $0x30] sm:$0xff] }
  0x4d   :  { %507 = vmatpush3.bf16.msra.mxu0 %v506_v4  ;;  %510 = vmatpush3.bf16.msra.mxu1 %v509_v8  ;;  %v515_v14 = vpack.c.bf16 %v172_v13, %v171_v12  ;;  %v174_v16 = vld [vmem:[#allocation7 + $0x38] sm:$0xff]  ;;  %v175_v18 = vld [vmem:[#allocation7 + $0x40] sm:$0xff]  ;;  %v176_v19 = vld [vmem:[#allocation7 + $0x48] sm:$0xff] }
  0x4e   :  { %532 = vmatprep.subr.bf16.mxu0 %v694_v0  ;;  %511 = vmatprep.subr.bf16.mxu1 %v694_v0  ;;  %v518_v17 = vpack.c.bf16 %v174_v16, %v173_v15  ;;  %v521_v20 = vpack.c.bf16 %v176_v19, %v175_v18  ;;  %v177_v21 = vld [vmem:[#allocation7 + $0x50] sm:$0xff]  ;;  %v178_v22 = vld [vmem:[#allocation7 + $0x58] sm:$0xff]  ;;  %v179_v24 = vld [vmem:[#allocation7 + $0x60] sm:$0xff] }
  0x4f   :  { %v524_v23 = vpack.c.bf16 %v178_v22, %v177_v21  ;;  %v180_v25 = vld [vmem:[#allocation7 + $0x68] sm:$0xff]  ;;  %v181_v27 = vld [vmem:[#allocation7 + $0x70] sm:$0xff]  ;;  %v182_v28 = vld [vmem:[#allocation7 + $0x78] sm:$0xff] }
  0x50   :  { %433 = vmatmul.mubr.msk.f32.vlgmr.msra.gmra.mrb[0].mxu0 %vm90_vm1, %v80_v10  ;;  %v527_v26 = vpack.c.bf16 %v180_v25, %v179_v24  ;;  %v530_v29 = vpack.c.bf16 %v182_v28, %v181_v27  ;;  %v263_v30 = vld [vmem:[#allocation8] sm:$0xff]  ;;  %v264_v31 = vld [vmem:[#allocation8 + $0x8] sm:$0xff]  ;;  %v265_v32 = vld [vmem:[#allocation8 + $0x10] sm:$0xff] }
  0x51   :  { %502 = vmatprep.mubr.msk.f32.mxu0 %vm695_vm0, %v696_v1  ;;  %513 = vmatpush3.bf16.msra.mxu1 %v512_v11  ;;  %v533_v33 = vpack.c.bf16 %v264_v31, %v263_v30  ;;  %v266_v34 = vld [vmem:[#allocation8 + $0x18] sm:$0xff]  ;;  %v267_v36 = vld [vmem:[#allocation8 + $0x20] sm:$0xff]  ;;  %v268_v37 = vld [vmem:[#allocation8 + $0x28] sm:$0xff] }
  0x52   :  { %514 = vmatprep.subr.bf16.mxu1 %v694_v0  ;;  %v536_v35 = vpack.c.bf16 %v266_v34, %v265_v32  ;;  %v539_v38 = vpack.c.bf16 %v268_v37, %v267_v36  ;;  %v269_v39 = vld [vmem:[#allocation8 + $0x30] sm:$0xff]  ;;  %v270_v40 = vld [vmem:[#allocation8 + $0x38] sm:$0xff]  ;;  %v271_v42 = vld [vmem:[#allocation8 + $0x40] sm:$0xff] }
  0x53   :  { %534 = vmatpush3.bf16.msra.mxu0 %v533_v33  ;;  %v542_v41 = vpack.c.bf16 %v270_v40, %v269_v39  ;;  %v272_v43 = vld [vmem:[#allocation8 + $0x48] sm:$0xff]  ;;  %v273_v45 = vld [vmem:[#allocation8 + $0x50] sm:$0xff]  ;;  %v274_v46 = vld [vmem:[#allocation8 + $0x58] sm:$0xff] }
  0x54   :  { %535 = vmatprep.subr.bf16.mxu0 %v694_v0  ;;  %v545_v44 = vpack.c.bf16 %v272_v43, %v271_v42  ;;  %v548_v47 = vpack.c.bf16 %v274_v46, %v273_v45  ;;  %v275_v48 = vld [vmem:[#allocation8 + $0x60] sm:$0xff]  ;;  %v276_v49 = vld [vmem:[#allocation8 + $0x68] sm:$0xff]  ;;  %v277_v57 = vld [vmem:[#allocation8 + $0x70] sm:$0xff] }
  0x55   :  { %516 = vmatpush3.bf16.msra.mxu1 %v515_v14  ;;  %v551_v50 = vpack.c.bf16 %v276_v49, %v275_v48  ;;  %v387_v51 = vld [vmem:[%s838_s2] ss:$0 sm:$0xff]  ;;  %v278_v58 = vld [vmem:[#allocation8 + $0x78] sm:$0xff] }
  0x56   :  { %517 = vmatprep.subr.bf16.mxu1 %v694_v0  ;;  %v554_v59 = vpack.c.bf16 %v278_v58, %v277_v57  ;;  %v389_v60 = vld [vmem:[%s840_s4] ss:$0 sm:$0xff]  ;;  %s697_s4 = smov [#allocation10]  }
  0x57   :  { %537 = vmatpush3.bf16.msra.mxu0 %v536_v35  ;;  %v390_v2 = vld [vmem:[%s842_s6] ss:$0 sm:$0xff]  ;;  %s376_s28 = sshll.u32 %s697_s4, 4  ;;  %s377_s28 = int_to_ptr.vmem [resolvable:$true] %s376_s28 }
  0x58   :  { %538 = vmatprep.subr.bf16.mxu0 %v694_v0  ;;  %s658_s6 = scalar_lea.vmem %s377_s28, 128  ;;  %p663_p5 = scmp.lt.s32.totalorder %s377_s28, %s377_s28 }
  0x59   :  { %519 = vmatpush3.bf16.msra.mxu1 %v518_v17  ;;  %p659_p4 = scmp.ne.s32.totalorder %s377_s28, %s658_s6  ;;  %p664_p6 = scmp.lt.s32.totalorder %s658_s6, %s658_s6 }
  0x5a   :  { %520 = vmatprep.subr.bf16.mxu1 %v694_v0 }
  0x5b   :  { %540 = vmatpush3.bf16.msra.mxu0 %v539_v38  ;;  %p665_p7 = por %p664_p6, %p663_p5 }
  0x5c   :  { %541 = vmatprep.subr.bf16.mxu0 %v694_v0 }
  0x5d   :  { %522 = vmatpush3.bf16.msra.mxu1 %v521_v20  ;;  %p666_p8 = pnand %p665_p7, %p659_p4 }
  0x5e   :  { %523 = vmatprep.subr.bf16.mxu1 %v694_v0 }
  0x5f   :  { %543 = vmatpush3.bf16.msra.mxu0 %v542_v41 }
  0x60   :  { %544 = vmatprep.subr.bf16.mxu0 %v694_v0 }
  0x61   :  { %525 = vmatpush3.bf16.msra.mxu1 %v524_v23 }
  0x62   :  { %526 = vmatprep.subr.bf16.mxu1 %v694_v0 }
  0x63   :  { %546 = vmatpush3.bf16.msra.mxu0 %v545_v44 }
  0x64   :  { %547 = vmatprep.subr.bf16.mxu0 %v694_v0 }
  0x65   :  { %528 = vmatpush3.bf16.msra.mxu1 %v527_v26 }
  0x66   :  { %529 = vmatprep.subr.bf16.mxu1 %v694_v0 }
  0x67   :  { %549 = vmatpush3.bf16.msra.mxu0 %v548_v47 }
  0x68   :  { %550 = vmatprep.subr.bf16.mxu0 %v694_v0 }
  0x69   :  { %531 = vmatpush3.bf16.msra.mxu1 %v530_v29 }
  0x6b   :  { %552 = vmatpush3.bf16.msra.mxu0 %v551_v50 }
  0x6c   :  { %553 = vmatprep.subr.bf16.mxu0 %v694_v0 }
  0x6f   :  { %555 = vmatpush3.bf16.msra.mxu0 %v554_v59 }
 0x123   :  { %v160_v52 = vpop.f32.mrb[0].mxu0 }
 0x124   :  { %v161_v53 = vadd.f32 %v387_v51, %v160_v52  ;;  %v434_v54 = vpop.f32.mrb[1].mxu0 }
 0x126   :  { %v165_v55 = vmul.f32 0.01, %v161_v53  ;;  %vm164_vm2 = vcmp.gt.f32.partialorder %v161_v53, 0.0 }
 0x128   :  { %v166_v56 = vsel %vm164_vm2, %v161_v53, %v165_v55 }
 0x129   :  { %468 = vmatmul.mubr.f32.vlgmr.msra.gmra.mrb[0].mxu1 %v166_v56 }
 0x1fc   :  { %v256_v61 = vpop.f32.mrb[0].mxu1 }
 0x1fd   :  { %v257_v62 = vadd.f32 %v389_v60, %v256_v61  ;;  %v469_v63 = vpop.f32.mrb[1].mxu1 }
 0x1ff   :  { %vm260_vm3 = vcmp.gt.f32.partialorder %v257_v62, 0.0  ;;  %v261_v0 = vmul.f32 0.01, %v257_v62 }
 0x201   :  { %v262_v1 = vsel %vm260_vm3, %v257_v62, %v261_v0 }
 0x202   :  { %503 = vmatmul.mubr.f32.vlgmr.msra.gmra.mrb[2].mxu0 %v262_v1 }
 0x2d5   :  { %v352_v3 = vpop.f32.mrb[2].mxu0 }
 0x2d6   :  { %v353_v4 = vadd.f32 %v390_v2, %v352_v3  ;;  %v504_v5 = vpop.f32.mrb[3].mxu0 }
 0x2d8   :  { %356 = vmax.xlane.f32.xlu0 %v353_v4 }
 0x365   :  { %v357_v6 = vpop.xlane.xlu0 %356 }
 0x366   :  { %v358_v7 = vsub.f32 %v353_v4, %v357_v6 }
 0x368   :  { %v359_v8 = vmul.f32 1.442695, %v358_v7 }
 0x36a   :  { %566 = vpow2.f32 %v359_v8 }
 0x374   :  { %v567_v9 = vpop.eup %566 }
 0x375   :  { %361 = vadd.xlane.f32.xlu0 %v567_v9 }
 0x402   :  { %v362_v10 = vpop.xlane.xlu0 %361 }
 0x403   :  { %568 = vrcp.f32 %v362_v10 }
 0x40d   :  { %v569_v11 = vpop.eup %568 }
 0x40e   :  { %v364_v12 = vmul.f32 %v569_v11, %v362_v10 }
 0x410   :  { %v365_v13 = vsub.f32 2.0, %v364_v12 }
 0x412   :  { %v366_v14 = vmul.f32 %v569_v11, %v365_v13 }
 0x414   :  { %v367_v15 = vmul.f32 %v567_v9, %v366_v14 }
 0x416   :  { %369 = vst.msk [vmem:[#allocation10] sm:$0xff] %vm368_vm4, %v367_v15 }
 0x417   :  { %669 = shalt.err (!%p666_p8)
}
 0x418   :  { %s670_s8 = scalar_lea.hbm %s843_s7, 128 }
 0x419   :  { %p671_p9 = scmp.ne.s32.totalorder %s843_s7, %s670_s8  ;;  %p674_p10 = scmp.lt.u32.totalorder %s670_s8, %s843_s7 }
 0x41b   :  { %p676_p11 = pnand %p674_p10, %p671_p9 }
 0x41d   :  { %679 = shalt.err (!%p676_p11)
}
 0x41e   :  { %379 = dma.vmem_to_hbm [thread:$0]  %s377_s28, 128, %s843_s7, [#allocation4]  }
 0x41f   :  { %686 = dma.done.wait [#allocation4], 128  }
 0x420   :  { %687 = vsyncadd [#allocation4], 4294967168 }
 0x421   :  { %383 = vsyncpa [#allocation3], 1 }
 0x422   :  { %384 = vsyncpa [#allocation6], 1 }
 0x423   :  { %385 = vsyncpa [#allocation9], 1 }
 0x424   :  { %386 = vsyncpa [#allocation4], 1 }

</bundles_post_ra>
